<compile_context>
chip_gen: v7x
topology: tpu7x:2x2x1
jax: 0.10.0
libtpu: 0.0.40
codegen_flags: <defaults>
</compile_context>

<pallas_src>
import functools

import jax
import jax.numpy as jnp
from jax.experimental import pallas as pl
from jax.experimental.pallas import tpu as pltpu

_LANE = 128                     # lane width: feature dims padded to this
_SUBLANE = 16                   # bf16 sublane packing -> batch tiles x16
_MAX_TB = 1024                  # batch-tile cap
_VMEM_CAP = 64 * 1024 * 1024    # <= v7x physical VMEM, >> default scoped limit


def _round_up(x, m):
    return ((x + m - 1) // m) * m


def _fused_mlp_kernel(*refs, num_layers):
    """Whole MLP in one kernel body (statically unrolled layer loop).

    refs = (x_ref, w_0, b_0, ..., w_{L-1}, b_{L-1}, o_ref)
      x_ref : (TB, Din_pad)           bf16 activations (zero-padded lanes)
      w_l   : (Din_l_pad, Dout_l_pad) bf16, VMEM-resident
      b_l   : (1, Dout_l_pad)         f32,  VMEM-resident
      o_ref : (TB, Dout_pad)          f32 lane-dense output slab
    """
    x_ref, o_ref = refs[0], refs[-1]
    wb = refs[1:-1]
    h = x_ref[...]                                  # bf16, straight to the MXU
    for l in range(num_layers):
        w = wb[2 * l][...]
        b = wb[2 * l + 1][...]
        # bf16 MXU matmul, f32 accumulation, f32 bias epilogue.
        y = jnp.dot(h, w, preferred_element_type=jnp.float32) + b
        if l < num_layers - 1:
            # ReLU then immediate bf16 re-pack (halves the live intermediate).
            h = jnp.maximum(y, 0.0).astype(jnp.bfloat16)
            # TODO(synk): training-mode dropout mask would go here
            # (pltpu.prng_random_bits); eval-mode dropout is identity.
        else:
            h = y                                   # final layer: no ReLU
    o_ref[...] = h.astype(o_ref.dtype)


def init_base_mlp_params(key, arch, input_size, output_size):
    """Deterministic init mimicking nn.Linear default
    (uniform(-1/sqrt(fan_in), 1/sqrt(fan_in))); weights stored as
    (fan_in, fan_out) == transpose of PyTorch's (fan_out, fan_in)."""
    params = []
    sizes = [input_size] + list(arch) + [output_size]
    for i in range(len(sizes) - 1):
        fan_in, fan_out = sizes[i], sizes[i + 1]
        key, kw, kb = jax.random.split(key, 3)
        bound = 1.0 / jnp.sqrt(jnp.float32(fan_in))
        w = jax.random.uniform(kw, (fan_in, fan_out), jnp.float32, -bound, bound)
        b = jax.random.uniform(kb, (fan_out,), jnp.float32, -bound, bound)
        params.append((w, b))
    return params


def pack_base_mlp_params(params):
    """Zero-pad each layer's (w, b) to its OWN lane-aligned shape (done once).

    Per-layer padding (instead of a uniform (L, D, D) cube) avoids wasting MXU
    FLOPs and weight VMEM on non-uniform architectures.  Padded rows/cols and
    padded bias lanes are zero, so padded lanes stay exactly zero through the
    ReLU chain and are simply sliced off outside.
    """
    packed = []
    for w, b in params:
        fi, fo = w.shape
        fip, fop = _round_up(fi, _LANE), _round_up(fo, _LANE)
        wp = jnp.zeros((fip, fop), jnp.bfloat16).at[:fi, :fo].set(
            w.astype(jnp.bfloat16))
        bp = jnp.zeros((1, fop), jnp.float32).at[0, :fo].set(
            b.astype(jnp.float32))
        packed.append((wp, bp))
    return packed, params[-1][0].shape[1]


def base_mlp_forward_fused(x, packed_params, out_size):
    """Fused BaseMLP forward: bf16 pad -> single pallas_call -> slice."""
    B, Din = x.shape
    L = len(packed_params)
    din_pad = packed_params[0][0].shape[0]
    dout_pad = packed_params[-1][0].shape[1]

    # --- batch tiling: multiple of 16; aim for >=2 grid steps when the batch
    # allows (keeps both v7x TensorCores busy via "parallel"); cap at _MAX_TB;
    # shrink if the VMEM estimate would blow the cap.
    B16 = _round_up(max(B, 1), _SUBLANE)
    TB = min(_MAX_TB, max(_SUBLANE, _round_up((B16 + 1) // 2, _SUBLANE)))

    w_bytes = sum(int(w.size) * 2 for w, _ in packed_params)
    b_bytes = sum(int(b.size) * 4 for _, b in packed_params)
    max_d = max(int(w.shape[1]) for w, _ in packed_params)

    def vmem_need(tb):
        act_in = 2 * tb * din_pad * 2       # double-buffered bf16 input tiles
        act_out = 2 * tb * dout_pad * 4     # double-buffered f32 output tiles
        inter = 2 * tb * max_d * 4          # live f32 intermediates (generous)
        # 2x weights covers the double-buffered fallback path.
        return 2 * w_bytes + b_bytes + act_in + act_out + inter + (2 << 20)

    while TB > _SUBLANE and vmem_need(TB) > _VMEM_CAP:
        TB = max(_SUBLANE, _round_up(TB // 2, _SUBLANE))
    Bp = _round_up(B16, TB)
    vmem_limit = int(min(_VMEM_CAP, max(vmem_need(TB), 32 << 20)))

    # Single bf16 pad op (half the bytes of an f32 pad, feature dim only to
    # the first layer's padded fan-in).
    xp = jnp.pad(x.astype(jnp.bfloat16), ((0, Bp - B), (0, din_pad - Din)))

    flat_wb = [a for wb in packed_params for a in wb]
    kernel = functools.partial(_fused_mlp_kernel, num_layers=L)

    def make_call(single_buffer_weights):
        resident_kwargs = (
            dict(pipeline_mode=pl.Buffered(1)) if single_buffer_weights else {})
        in_specs = [pl.BlockSpec((TB, din_pad), lambda i: (i, 0))]
        for w, b in packed_params:
            # Constant index_map -> VMEM-resident across the whole grid.
            in_specs.append(
                pl.BlockSpec(tuple(w.shape), lambda i: (0, 0), **resident_kwargs))
            in_specs.append(
                pl.BlockSpec(tuple(b.shape), lambda i: (0, 0), **resident_kwargs))
        return pl.pallas_call(
            kernel,
            out_shape=jax.ShapeDtypeStruct((Bp, dout_pad), jnp.float32),
            grid=(Bp // TB,),
            in_specs=in_specs,
            out_specs=pl.BlockSpec((TB, dout_pad), lambda i: (i, 0)),
            compiler_params=pltpu.CompilerParams(
                dimension_semantics=("parallel",),   # shard batch on v7x 2 TCs
                vmem_limit_bytes=vmem_limit),
        )

    try:
        # Buffered(1): weights/biases never change block index, so one VMEM
        # copy suffices -> halves the dominant VMEM consumer.
        out_padded = make_call(True)(xp, *flat_wb)
    except Exception:
        # Fallback if this JAX build rejects pipeline_mode on pallas_call specs.
        out_padded = make_call(False)(xp, *flat_wb)

    return out_padded[:B, :out_size]


if __name__ == "__main__":
    key = jax.random.PRNGKey(0)
    k_params, k_x = jax.random.split(key)

    # Small shapes consistent with the module: arch=[32, 32], input_size=16,
    # output_size=2, batch=8.
    arch = [32, 32]
    input_size = 16
    output_size = 2
    batch = 8

    params = init_base_mlp_params(k_params, arch, input_size, output_size)
    packed, out_size = pack_base_mlp_params(params)
    x = jax.random.normal(k_x, (batch, input_size), jnp.float32)

    out = base_mlp_forward_fused(x, packed, out_size)
    out = jax.block_until_ready(out)

    # Reference mirroring the kernel's numerics: bf16 MXU inputs, f32 accum,
    # f32 bias/ReLU epilogue, bf16 re-pack between layers.  (Documented
    # ~1e-2-relative drift vs. a pure-f32 PyTorch BaseMLP.)
    ref = x.astype(jnp.bfloat16)
    for w, b in params[:-1]:
        y = jnp.dot(ref, w.astype(jnp.bfloat16),
                    preferred_element_type=jnp.float32) + b
        ref = jnp.maximum(y, 0.0).astype(jnp.bfloat16)
    wf, bf_ = params[-1]
    ref = jnp.dot(ref, wf.astype(jnp.bfloat16),
                  preferred_element_type=jnp.float32) + bf_

    assert out.shape == (batch, output_size)
    err = float(jnp.max(jnp.abs(out - ref)))
    assert jnp.allclose(out, ref, atol=5e-3, rtol=5e-3), err

    print("KERNEL_OK")
</pallas_src>

<mosaic_0001>
module attributes {stable_mosaic.version = 11 : i64} {
  func.func @_fused_mlp_kernel(%arg0: i32, %arg1: memref<16x128xbf16, #tpu.memory_space<vmem>>, %arg2: memref<128x128xbf16, #tpu.memory_space<vmem>>, %arg3: memref<1x128xf32, #tpu.memory_space<vmem>>, %arg4: memref<128x128xbf16, #tpu.memory_space<vmem>>, %arg5: memref<1x128xf32, #tpu.memory_space<vmem>>, %arg6: memref<128x128xbf16, #tpu.memory_space<vmem>>, %arg7: memref<1x128xf32, #tpu.memory_space<vmem>>, %arg8: memref<16x128xf32, #tpu.memory_space<vmem>>) attributes {dimension_semantics = [#tpu.dimension_semantics<parallel>], iteration_bounds = array<i64: 1>, scalar_prefetch = 0 : i64, scratch_operands = 0 : i64, tpu.core_type = #tpu.core_type<tc>, window_params = [{transform_indices = @transform_0, window_bounds = array<i64: 16, 128>}, {pipeline_mode = #tpu.pipeline_mode<synchronous>, transform_indices = @transform_1, window_bounds = array<i64: 128, 128>}, {pipeline_mode = #tpu.pipeline_mode<synchronous>, transform_indices = @transform_2, window_bounds = array<i64: 1, 128>}, {pipeline_mode = #tpu.pipeline_mode<synchronous>, transform_indices = @transform_3, window_bounds = array<i64: 128, 128>}, {pipeline_mode = #tpu.pipeline_mode<synchronous>, transform_indices = @transform_4, window_bounds = array<i64: 1, 128>}, {pipeline_mode = #tpu.pipeline_mode<synchronous>, transform_indices = @transform_5, window_bounds = array<i64: 128, 128>}, {pipeline_mode = #tpu.pipeline_mode<synchronous>, transform_indices = @transform_6, window_bounds = array<i64: 1, 128>}, {transform_indices = @transform_7, window_bounds = array<i64: 16, 128>}]} {
    %c0 = arith.constant 0 : index
    %c0_0 = arith.constant 0 : index
    %0 = vector.load %arg1[%c0, %c0_0] : memref<16x128xbf16, #tpu.memory_space<vmem>>, vector<16x128xbf16>
    %c0_1 = arith.constant 0 : index
    %c0_2 = arith.constant 0 : index
    %1 = vector.load %arg2[%c0_1, %c0_2] : memref<128x128xbf16, #tpu.memory_space<vmem>>, vector<128x128xbf16>
    %c0_3 = arith.constant 0 : index
    %c0_4 = arith.constant 0 : index
    %2 = vector.load %arg3[%c0_3, %c0_4] : memref<1x128xf32, #tpu.memory_space<vmem>>, vector<1x128xf32>
    %cst = arith.constant dense<0.000000e+00> : vector<16x128xf32>
    %3 = tpu.matmul %0, %1, %cst {dimension_numbers = #tpu.dot_dimension_numbers<[1], [0], [0], [1], [0, 0, 1, 1], [], []>} : vector<16x128xbf16>, vector<128x128xbf16>, vector<16x128xf32> -> vector<16x128xf32>
    %4 = vector.broadcast %2 : vector<1x128xf32> to vector<16x128xf32>
    %5 = arith.addf %3, %4 : vector<16x128xf32>
    %cst_5 = arith.constant 0.000000e+00 : f32
    %6 = vector.broadcast %cst_5 : f32 to vector<16x128xf32>
    %7 = arith.maximumf %5, %6 : vector<16x128xf32>
    %8 = arith.truncf %7 : vector<16x128xf32> to vector<16x128xbf16>
    %c0_6 = arith.constant 0 : index
    %c0_7 = arith.constant 0 : index
    %9 = vector.load %arg4[%c0_6, %c0_7] : memref<128x128xbf16, #tpu.memory_space<vmem>>, vector<128x128xbf16>
    %c0_8 = arith.constant 0 : index
    %c0_9 = arith.constant 0 : index
    %10 = vector.load %arg5[%c0_8, %c0_9] : memref<1x128xf32, #tpu.memory_space<vmem>>, vector<1x128xf32>
    %cst_10 = arith.constant dense<0.000000e+00> : vector<16x128xf32>
    %11 = tpu.matmul %8, %9, %cst_10 {dimension_numbers = #tpu.dot_dimension_numbers<[1], [0], [0], [1], [0, 0, 1, 1], [], []>} : vector<16x128xbf16>, vector<128x128xbf16>, vector<16x128xf32> -> vector<16x128xf32>
    %12 = vector.broadcast %10 : vector<1x128xf32> to vector<16x128xf32>
    %13 = arith.addf %11, %12 : vector<16x128xf32>
    %cst_11 = arith.constant 0.000000e+00 : f32
    %14 = vector.broadcast %cst_11 : f32 to vector<16x128xf32>
    %15 = arith.maximumf %13, %14 : vector<16x128xf32>
    %16 = arith.truncf %15 : vector<16x128xf32> to vector<16x128xbf16>
    %c0_12 = arith.constant 0 : index
    %c0_13 = arith.constant 0 : index
    %17 = vector.load %arg6[%c0_12, %c0_13] : memref<128x128xbf16, #tpu.memory_space<vmem>>, vector<128x128xbf16>
    %c0_14 = arith.constant 0 : index
    %c0_15 = arith.constant 0 : index
    %18 = vector.load %arg7[%c0_14, %c0_15] : memref<1x128xf32, #tpu.memory_space<vmem>>, vector<1x128xf32>
    %cst_16 = arith.constant dense<0.000000e+00> : vector<16x128xf32>
    %19 = tpu.matmul %16, %17, %cst_16 {dimension_numbers = #tpu.dot_dimension_numbers<[1], [0], [0], [1], [0, 0, 1, 1], [], []>} : vector<16x128xbf16>, vector<128x128xbf16>, vector<16x128xf32> -> vector<16x128xf32>
    %20 = vector.broadcast %18 : vector<1x128xf32> to vector<16x128xf32>
    %21 = arith.addf %19, %20 : vector<16x128xf32>
    %c0_17 = arith.constant 0 : index
    %c0_18 = arith.constant 0 : index
    %22 = vector.load %arg8[%c0_17, %c0_18] : memref<16x128xf32, #tpu.memory_space<vmem>>, vector<16x128xf32>
    tpu.vector_store %arg8[%c0_17, %c0_18], %21 {strides = array<i32>} : memref<16x128xf32, #tpu.memory_space<vmem>>, vector<16x128xf32>,
    return
  }
  func.func @transform_0(%arg0: i32) -> (i32, i32) {
    %c0_i32 = arith.constant 0 : i32
    %c0_i32_0 = arith.constant 0 : i32
    return %arg0, %c0_i32 : i32, i32
  }
  func.func @transform_1(%arg0: i32) -> (i32, i32) {
    %c0_i32 = arith.constant 0 : i32
    %c0_i32_0 = arith.constant 0 : i32
    %c0_i32_1 = arith.constant 0 : i32
    return %c0_i32, %c0_i32_0 : i32, i32
  }
  func.func @transform_2(%arg0: i32) -> (i32, i32) {
    %c0_i32 = arith.constant 0 : i32
    %c0_i32_0 = arith.constant 0 : i32
    %c0_i32_1 = arith.constant 0 : i32
    return %c0_i32, %c0_i32_0 : i32, i32
  }
  func.func @transform_3(%arg0: i32) -> (i32, i32) {
    %c0_i32 = arith.constant 0 : i32
    %c0_i32_0 = arith.constant 0 : i32
    %c0_i32_1 = arith.constant 0 : i32
    return %c0_i32, %c0_i32_0 : i32, i32
  }
  func.func @transform_4(%arg0: i32) -> (i32, i32) {
    %c0_i32 = arith.constant 0 : i32
    %c0_i32_0 = arith.constant 0 : i32
    %c0_i32_1 = arith.constant 0 : i32
    return %c0_i32, %c0_i32_0 : i32, i32
  }
  func.func @transform_5(%arg0: i32) -> (i32, i32) {
    %c0_i32 = arith.constant 0 : i32
    %c0_i32_0 = arith.constant 0 : i32
    %c0_i32_1 = arith.constant 0 : i32
    return %c0_i32, %c0_i32_0 : i32, i32
  }
  func.func @transform_6(%arg0: i32) -> (i32, i32) {
    %c0_i32 = arith.constant 0 : i32
    %c0_i32_0 = arith.constant 0 : i32
    %c0_i32_1 = arith.constant 0 : i32
    return %c0_i32, %c0_i32_0 : i32, i32
  }
  func.func @transform_7(%arg0: i32) -> (i32, i32) {
    %c0_i32 = arith.constant 0 : i32
    %c0_i32_0 = arith.constant 0 : i32
    return %arg0, %c0_i32 : i32, i32
  }
}

module attributes {stable_mosaic.version = 11 : i64} {
  func.func @_fused_mlp_kernel(%arg0: i32, %arg1: memref<16x128xbf16, #tpu.memory_space<vmem>>, %arg2: memref<128x128xbf16, #tpu.memory_space<vmem>>, %arg3: memref<1x128xf32, #tpu.memory_space<vmem>>, %arg4: memref<128x128xbf16, #tpu.memory_space<vmem>>, %arg5: memref<1x128xf32, #tpu.memory_space<vmem>>, %arg6: memref<128x128xbf16, #tpu.memory_space<vmem>>, %arg7: memref<1x128xf32, #tpu.memory_space<vmem>>, %arg8: memref<16x128xf32, #tpu.memory_space<vmem>>) attributes {dimension_semantics = [#tpu.dimension_semantics<parallel>], iteration_bounds = array<i64: 1>, scalar_prefetch = 0 : i64, scratch_operands = 0 : i64, tpu.core_type = #tpu.core_type<tc>, window_params = [{transform_indices = @transform_0, window_bounds = array<i64: 16, 128>}, {pipeline_mode = #tpu.pipeline_mode<synchronous>, transform_indices = @transform_1, window_bounds = array<i64: 128, 128>}, {pipeline_mode = #tpu.pipeline_mode<synchronous>, transform_indices = @transform_2, window_bounds = array<i64: 1, 128>}, {pipeline_mode = #tpu.pipeline_mode<synchronous>, transform_indices = @transform_3, window_bounds = array<i64: 128, 128>}, {pipeline_mode = #tpu.pipeline_mode<synchronous>, transform_indices = @transform_4, window_bounds = array<i64: 1, 128>}, {pipeline_mode = #tpu.pipeline_mode<synchronous>, transform_indices = @transform_5, window_bounds = array<i64: 128, 128>}, {pipeline_mode = #tpu.pipeline_mode<synchronous>, transform_indices = @transform_6, window_bounds = array<i64: 1, 128>}, {transform_indices = @transform_7, window_bounds = array<i64: 16, 128>}]} {
    %c0 = arith.constant 0 : index
    %c0_0 = arith.constant 0 : index
    %0 = vector.load %arg1[%c0, %c0_0] : memref<16x128xbf16, #tpu.memory_space<vmem>>, vector<16x128xbf16>
    %c0_1 = arith.constant 0 : index
    %c0_2 = arith.constant 0 : index
    %1 = vector.load %arg2[%c0_1, %c0_2] : memref<128x128xbf16, #tpu.memory_space<vmem>>, vector<128x128xbf16>
    %c0_3 = arith.constant 0 : index
    %c0_4 = arith.constant 0 : index
    %2 = vector.load %arg3[%c0_3, %c0_4] : memref<1x128xf32, #tpu.memory_space<vmem>>, vector<1x128xf32>
    %cst = arith.constant dense<0.000000e+00> : vector<16x128xf32>
    %3 = tpu.matmul %0, %1, %cst {dimension_numbers = #tpu.dot_dimension_numbers<[1], [0], [0], [1], [0, 0, 1, 1], [], []>} : vector<16x128xbf16>, vector<128x128xbf16>, vector<16x128xf32> -> vector<16x128xf32>
    %4 = vector.broadcast %2 : vector<1x128xf32> to vector<16x128xf32>
    %5 = arith.addf %3, %4 : vector<16x128xf32>
    %cst_5 = arith.constant 0.000000e+00 : f32
    %6 = vector.broadcast %cst_5 : f32 to vector<16x128xf32>
    %7 = arith.maximumf %5, %6 : vector<16x128xf32>
    %8 = arith.truncf %7 : vector<16x128xf32> to vector<16x128xbf16>
    %c0_6 = arith.constant 0 : index
    %c0_7 = arith.constant 0 : index
    %9 = vector.load %arg4[%c0_6, %c0_7] : memref<128x128xbf16, #tpu.memory_space<vmem>>, vector<128x128xbf16>
    %c0_8 = arith.constant 0 : index
    %c0_9 = arith.constant 0 : index
    %10 = vector.load %arg5[%c0_8, %c0_9] : memref<1x128xf32, #tpu.memory_space<vmem>>, vector<1x128xf32>
    %cst_10 = arith.constant dense<0.000000e+00> : vector<16x128xf32>
    %11 = tpu.matmul %8, %9, %cst_10 {dimension_numbers = #tpu.dot_dimension_numbers<[1], [0], [0], [1], [0, 0, 1, 1], [], []>} : vector<16x128xbf16>, vector<128x128xbf16>, vector<16x128xf32> -> vector<16x128xf32>
    %12 = vector.broadcast %10 : vector<1x128xf32> to vector<16x128xf32>
    %13 = arith.addf %11, %12 : vector<16x128xf32>
    %cst_11 = arith.constant 0.000000e+00 : f32
    %14 = vector.broadcast %cst_11 : f32 to vector<16x128xf32>
    %15 = arith.maximumf %13, %14 : vector<16x128xf32>
    %16 = arith.truncf %15 : vector<16x128xf32> to vector<16x128xbf16>
    %c0_12 = arith.constant 0 : index
    %c0_13 = arith.constant 0 : index
    %17 = vector.load %arg6[%c0_12, %c0_13] : memref<128x128xbf16, #tpu.memory_space<vmem>>, vector<128x128xbf16>
    %c0_14 = arith.constant 0 : index
    %c0_15 = arith.constant 0 : index
    %18 = vector.load %arg7[%c0_14, %c0_15] : memref<1x128xf32, #tpu.memory_space<vmem>>, vector<1x128xf32>
    %cst_16 = arith.constant dense<0.000000e+00> : vector<16x128xf32>
    %19 = tpu.matmul %16, %17, %cst_16 {dimension_numbers = #tpu.dot_dimension_numbers<[1], [0], [0], [1], [0, 0, 1, 1], [], []>} : vector<16x128xbf16>, vector<128x128xbf16>, vector<16x128xf32> -> vector<16x128xf32>
    %20 = vector.broadcast %18 : vector<1x128xf32> to vector<16x128xf32>
    %21 = arith.addf %19, %20 : vector<16x128xf32>
    %c0_17 = arith.constant 0 : index
    %c0_18 = arith.constant 0 : index
    %22 = vector.load %arg8[%c0_17, %c0_18] : memref<16x128xf32, #tpu.memory_space<vmem>>, vector<16x128xf32>
    tpu.vector_store %arg8[%c0_17, %c0_18], %21 {strides = array<i32>} : memref<16x128xf32, #tpu.memory_space<vmem>>, vector<16x128xf32>,
    return
  }
  func.func @transform_0(%arg0: i32) -> (i32, i32) {
    %c0_i32 = arith.constant 0 : i32
    %c0_i32_0 = arith.constant 0 : i32
    return %arg0, %c0_i32 : i32, i32
  }
  func.func @transform_1(%arg0: i32) -> (i32, i32) {
    %c0_i32 = arith.constant 0 : i32
    %c0_i32_0 = arith.constant 0 : i32
    %c0_i32_1 = arith.constant 0 : i32
    return %c0_i32, %c0_i32_0 : i32, i32
  }
  func.func @transform_2(%arg0: i32) -> (i32, i32) {
    %c0_i32 = arith.constant 0 : i32
    %c0_i32_0 = arith.constant 0 : i32
    %c0_i32_1 = arith.constant 0 : i32
    return %c0_i32, %c0_i32_0 : i32, i32
  }
  func.func @transform_3(%arg0: i32) -> (i32, i32) {
    %c0_i32 = arith.constant 0 : i32
    %c0_i32_0 = arith.constant 0 : i32
    %c0_i32_1 = arith.constant 0 : i32
    return %c0_i32, %c0_i32_0 : i32, i32
  }
  func.func @transform_4(%arg0: i32) -> (i32, i32) {
    %c0_i32 = arith.constant 0 : i32
    %c0_i32_0 = arith.constant 0 : i32
    %c0_i32_1 = arith.constant 0 : i32
    return %c0_i32, %c0_i32_0 : i32, i32
  }
  func.func @transform_5(%arg0: i32) -> (i32, i32) {
    %c0_i32 = arith.constant 0 : i32
    %c0_i32_0 = arith.constant 0 : i32
    %c0_i32_1 = arith.constant 0 : i32
    return %c0_i32, %c0_i32_0 : i32, i32
  }
  func.func @transform_6(%arg0: i32) -> (i32, i32) {
    %c0_i32 = arith.constant 0 : i32
    %c0_i32_0 = arith.constant 0 : i32
    %c0_i32_1 = arith.constant 0 : i32
    return %c0_i32, %c0_i32_0 : i32, i32
  }
  func.func @transform_7(%arg0: i32) -> (i32, i32) {
    %c0_i32 = arith.constant 0 : i32
    %c0_i32_0 = arith.constant 0 : i32
    return %arg0, %c0_i32 : i32, i32
  }
}

</mosaic_0001>

<bundles_post_ra>
// kernel: tpu_custom_call.1
= control target key start
LH: loop header
LB: loop body
LE: loop exit
PB: predicated region body
PF: predicated region fallthrough
CT: control target
= control target key end

     0   :  { %12 = vsyncpa [#allocation3], 0  ;;  %s899_s0 = inlined_call_operand.hbm [shape: bf16[16,128], index: 0, kind: input, shape index: {}]   ;;  %s900_s1 = inlined_call_operand.hbm [shape: bf16[128,128], index: 1, kind: input, shape index: {}]   ;;  %s901_s2 = inlined_call_operand.vmem [shape: f32[1,128], index: 2, kind: input, shape index: {}]   ;;  %s902_s3 = inlined_call_operand.hbm [shape: bf16[128,128], index: 3, kind: input, shape index: {}]   ;;  %s903_s4 = inlined_call_operand.vmem [shape: f32[1,128], index: 4, kind: input, shape index: {}]   ;;  %s904_s5 = inlined_call_operand.hbm [shape: bf16[128,128], index: 5, kind: input, shape index: {}]   ;;  %s905_s6 = inlined_call_operand.vmem [shape: f32[1,128], index: 6, kind: input, shape index: {}]   ;;  %s906_s7 = inlined_call_operand.hbm [shape: f32[16,128], index: 7, kind: output, shape index: {}]  }
   0x1   :  { %13 = vsyncpa [#allocation6], 0 }
   0x2   :  { %14 = vsyncpa [#allocation9], 0 }
   0x3   :  { %15 = vsyncpa [#allocation4], 0  ;;  %s723_s24 = smov [#allocation5]   ;;  %s724_s26 = smov [#allocation2]  }
   0x4   :  { %s33_s25 = sshll.u32 %s723_s24, 4  ;;  %s21_s27 = sshll.u32 %s724_s26, 4  ;;  %s34_s25 = int_to_ptr.vmem [resolvable:$true] %s33_s25  ;;  %s774_s27 = int_to_ptr.vmem [resolvable:$true] %s21_s27 }
   0x5   :  { %s605_s30 = scalar_lea.hbm %s900_s1, 1024 }
   0x6   :  { %p606_p0 = scmp.ne.s32.totalorder %s900_s1, %s605_s30  ;;  %p609_p1 = scmp.lt.u32.totalorder %s605_s30, %s900_s1 }
   0x8   :  { %p611_p2 = pnand %p609_p1, %p606_p0 }
   0xa   :  { %614 = shalt.err (!%p611_p2)
}
   0xb   :  { %s615_s12 = scalar_lea.vmem %s34_s25, 1024  ;;  %p620_p4 = scmp.lt.s32.totalorder %s34_s25, %s34_s25 }
   0xc   :  { %p616_p3 = scmp.ne.s32.totalorder %s34_s25, %s615_s12  ;;  %p621_p5 = scmp.lt.s32.totalorder %s615_s12, %s615_s12 }
   0xe   :  { %p622_p6 = por %p621_p5, %p620_p4 }
  0x10   :  { %p623_p7 = pnand %p622_p6, %p616_p3 }
  0x12   :  { %626 = shalt.err (!%p623_p7)
}
  0x13   :  { %s725_s13 = smov 64   ;;  %s726_s14 = smov 4  }
  0x14   :  { %39 = dma.hbm_to_vmem [thread:$0]  %s900_s1, 1024, %s34_s25, [#allocation6], %s725_s13, %s725_s13, %s726_s14  }
  0x15   :  { %s627_s19 = scalar_lea.hbm %s899_s0, 128 }
  0x16   :  { %p628_p8 = scmp.ne.s32.totalorder %s899_s0, %s627_s19  ;;  %p631_p9 = scmp.lt.u32.totalorder %s627_s19, %s899_s0 }
  0x18   :  { %p633_p10 = pnand %p631_p9, %p628_p8 }
  0x1a   :  { %636 = shalt.err (!%p633_p10)
}
  0x1b   :  { %s637_s24 = scalar_lea.vmem %s774_s27, 128  ;;  %p642_p12 = scmp.lt.s32.totalorder %s774_s27, %s774_s27 }
  0x1c   :  { %p638_p11 = scmp.ne.s32.totalorder %s774_s27, %s637_s24  ;;  %p643_p13 = scmp.lt.s32.totalorder %s637_s24, %s637_s24 }
  0x1e   :  { %p644_p0 = por %p643_p13, %p642_p12 }
  0x20   :  { %p645_p1 = pnand %p644_p0, %p638_p11 }
  0x22   :  { %648 = shalt.err (!%p645_p1)
}
  0x23   :  { %27 = dma.hbm_to_vmem [thread:$0]  %s899_s0, 128, %s774_s27, [#allocation3], %s725_s13, %s725_s13, %s726_s14  }
  0x24   :  { %s727_s26 = smov [#allocation7]   ;;  %s728_s29 = smov [#allocation8]  }
  0x25   :  { %s47_s28 = sshll.u32 %s727_s26, 4  ;;  %s61_s30 = sshll.u32 %s728_s29, 4  ;;  %s48_s28 = int_to_ptr.vmem [resolvable:$true] %s47_s28  ;;  %s811_s30 = int_to_ptr.vmem [resolvable:$true] %s61_s30 }
  0x26   :  { %s649_s10 = scalar_lea.hbm %s902_s3, 1024 }
  0x27   :  { %p650_p2 = scmp.ne.s32.totalorder %s902_s3, %s649_s10  ;;  %p653_p3 = scmp.lt.u32.totalorder %s649_s10, %s902_s3 }
  0x29   :  { %p655_p4 = pnand %p653_p3, %p650_p2 }
  0x2b   :  { %658 = shalt.err (!%p655_p4)
}
  0x2c   :  { %s659_s0 = scalar_lea.vmem %s48_s28, 1024  ;;  %p664_p6 = scmp.lt.s32.totalorder %s48_s28, %s48_s28 }
  0x2d   :  { %p660_p5 = scmp.ne.s32.totalorder %s48_s28, %s659_s0  ;;  %p665_p7 = scmp.lt.s32.totalorder %s659_s0, %s659_s0 }
  0x2f   :  { %p666_p8 = por %p665_p7, %p664_p6 }
  0x31   :  { %p667_p9 = pnand %p666_p8, %p660_p5 }
  0x33   :  { %670 = shalt.err (!%p667_p9)
}
  0x34   :  { %53 = dma.hbm_to_vmem [thread:$0]  %s902_s3, 1024, %s48_s28, [#allocation6], %s725_s13, %s725_s13, %s726_s14  }
  0x35   :  { %s671_s20 = scalar_lea.hbm %s904_s5, 1024 }
  0x36   :  { %p672_p10 = scmp.ne.s32.totalorder %s904_s5, %s671_s20  ;;  %p675_p11 = scmp.lt.u32.totalorder %s671_s20, %s904_s5 }
  0x38   :  { %p677_p12 = pnand %p675_p11, %p672_p10 }
  0x3a   :  { %680 = shalt.err (!%p677_p12)
}
  0x3b   :  { %s681_s1 = scalar_lea.vmem %s811_s30, 1024  ;;  %p686_p0 = scmp.lt.s32.totalorder %s811_s30, %s811_s30 }
  0x3c   :  { %p682_p13 = scmp.ne.s32.totalorder %s811_s30, %s681_s1  ;;  %p687_p1 = scmp.lt.s32.totalorder %s681_s1, %s681_s1 }
  0x3e   :  { %p688_p2 = por %p687_p1, %p686_p0 }
  0x40   :  { %p689_p3 = pnand %p688_p2, %p682_p13 }
  0x42   :  { %692 = shalt.err (!%p689_p3)
}
  0x43   :  { %67 = dma.hbm_to_vmem [thread:$0]  %s904_s5, 1024, %s811_s30, [#allocation9], %s725_s13, %s725_s13, %s726_s14  }
  0x44   :  { %715 = dma.done.wait [#allocation3], 128  }
  0x45   :  { %716 = vsyncadd [#allocation3], 4294967168 }
  0x46   :  { %717 = dma.done.wait [#allocation6], 2048  }
  0x47   :  { %718 = vsyncadd [#allocation6], 4294965248 }
  0x48   :  { %719 = dma.done.wait [#allocation9], 1024  }
  0x49   :  { %720 = vsyncadd [#allocation9], 4294966272  ;;  %v729_v0 = vmov 0.0   ;;  %vm730_vm0 = vmmov 0   ;;  %v580_v1 = vld [vmem:[#allocation5] sm:$0xff]   ;;  %v581_v2 = vld [vmem:[#allocation5 + $0x8] sm:$0xff]  }
  0x4a   :  { %509 = vmatprep.subr.bf16.mxu0 %v729_v0  ;;  %525 = vmatprep.mubr.msk.bf16.mxu0 %vm730_vm0, %v729_v0  ;;  %v582_v3 = vld [vmem:[#allocation5 + $0x10] sm:$0xff]   ;;  %v589_v4 = vld [vmem:[#allocation7] sm:$0xff]   ;;  %v583_v5 = vld [vmem:[#allocation5 + $0x18] sm:$0xff]   ;;  %s731_s29 = smov [#allocation10]  }
  0x4b   :  { %529 = vmatprep.subr.bf16.mxu1 %v729_v0  ;;  %545 = vmatprep.mubr.msk.bf16.mxu1 %vm730_vm0, %v729_v0  ;;  %v590_v6 = vld [vmem:[#allocation7 + $0x8] sm:$0xff]   ;;  %v584_v7 = vld [vmem:[#allocation5 + $0x20] sm:$0xff]   ;;  %v591_v8 = vld [vmem:[#allocation7 + $0x10] sm:$0xff]   ;;  %s440_s30 = sshll.u32 %s731_s29, 4  ;;  %s441_s30 = int_to_ptr.vmem [resolvable:$true] %s440_s30 }
  0x4c   :  { %510 = vmatpush3.bf16.msra.mxu0 %v580_v1  ;;  %530 = vmatpush3.bf16.msra.mxu1 %v589_v4  ;;  %v585_v9 = vld [vmem:[#allocation5 + $0x28] sm:$0xff]   ;;  %v592_v10 = vld [vmem:[#allocation7 + $0x18] sm:$0xff]   ;;  %v586_v11 = vld [vmem:[#allocation5 + $0x30] sm:$0xff]   ;;  %p698_p5 = scmp.lt.s32.totalorder %s441_s30, %s441_s30 }
  0x4d   :  { %511 = vmatprep.subr.bf16.mxu0 %v729_v0  ;;  %531 = vmatprep.subr.bf16.mxu1 %v729_v0  ;;  %v593_v12 = vld [vmem:[#allocation7 + $0x20] sm:$0xff]   ;;  %v587_v13 = vld [vmem:[#allocation5 + $0x38] sm:$0xff]   ;;  %v594_v14 = vld [vmem:[#allocation7 + $0x28] sm:$0xff]  }
  0x4e   :  { %v588_v15 = vld [vmem:[#allocation2] sm:$0xff]   ;;  %v595_v16 = vld [vmem:[#allocation7 + $0x30] sm:$0xff]   ;;  %v597_v18 = vld [vmem:[#allocation8] sm:$0xff]  }
  0x4f   :  { %v596_v17 = vld [vmem:[#allocation7 + $0x38] sm:$0xff]   ;;  %v598_v19 = vld [vmem:[#allocation8 + $0x8] sm:$0xff]   ;;  %v599_v20 = vld [vmem:[#allocation8 + $0x10] sm:$0xff]  }
  0x50   :  { %512 = vmatpush3.bf16.msra.mxu0 %v581_v2  ;;  %532 = vmatpush3.bf16.msra.mxu1 %v590_v6  ;;  %v600_v21 = vld [vmem:[#allocation8 + $0x18] sm:$0xff]   ;;  %v601_v22 = vld [vmem:[#allocation8 + $0x20] sm:$0xff]   ;;  %v602_v23 = vld [vmem:[#allocation8 + $0x28] sm:$0xff]  }
  0x51   :  { %513 = vmatprep.subr.bf16.mxu0 %v729_v0  ;;  %533 = vmatprep.subr.bf16.mxu1 %v729_v0  ;;  %v454_v24 = vld [vmem:[%s901_s2] ss:$0 sm:$0xff]  ;;  %v603_v34 = vld [vmem:[#allocation8 + $0x30] sm:$0xff]  }
  0x52   :  { %v604_v35 = vld [vmem:[#allocation8 + $0x38] sm:$0xff]  }
  0x53   :  { %v464_v36 = vld [vmem:[%s903_s4] ss:$0 sm:$0xff]  ;;  %s693_s4 = scalar_lea.vmem %s441_s30, 256 }
  0x54   :  { %514 = vmatpush3.bf16.msra.mxu0 %v582_v3  ;;  %534 = vmatpush3.bf16.msra.mxu1 %v591_v8  ;;  %v473_v46 = vld [vmem:[%s905_s6] ss:$0 sm:$0xff]  ;;  %p694_p4 = scmp.ne.s32.totalorder %s441_s30, %s693_s4  ;;  %p699_p6 = scmp.lt.s32.totalorder %s693_s4, %s693_s4 }
  0x55   :  { %515 = vmatprep.subr.bf16.mxu0 %v729_v0  ;;  %535 = vmatprep.subr.bf16.mxu1 %v729_v0 }
  0x56   :  { %p700_p7 = por %p699_p6, %p698_p5 }
  0x58   :  { %516 = vmatpush3.bf16.msra.mxu0 %v583_v5  ;;  %536 = vmatpush3.bf16.msra.mxu1 %v592_v10  ;;  %p701_p8 = pnand %p700_p7, %p694_p4 }
  0x59   :  { %517 = vmatprep.subr.bf16.mxu0 %v729_v0  ;;  %537 = vmatprep.subr.bf16.mxu1 %v729_v0 }
  0x5c   :  { %518 = vmatpush3.bf16.msra.mxu0 %v584_v7  ;;  %538 = vmatpush3.bf16.msra.mxu1 %v593_v12 }
  0x5d   :  { %519 = vmatprep.subr.bf16.mxu0 %v729_v0  ;;  %539 = vmatprep.subr.bf16.mxu1 %v729_v0 }
  0x60   :  { %520 = vmatpush3.bf16.msra.mxu0 %v585_v9  ;;  %540 = vmatpush3.bf16.msra.mxu1 %v594_v14 }
  0x61   :  { %521 = vmatprep.subr.bf16.mxu0 %v729_v0  ;;  %541 = vmatprep.subr.bf16.mxu1 %v729_v0 }
  0x64   :  { %522 = vmatpush3.bf16.msra.mxu0 %v586_v11  ;;  %542 = vmatpush3.bf16.msra.mxu1 %v595_v16 }
  0x65   :  { %523 = vmatprep.subr.bf16.mxu0 %v729_v0  ;;  %543 = vmatprep.subr.bf16.mxu1 %v729_v0 }
  0x68   :  { %524 = vmatpush3.bf16.msra.mxu0 %v587_v13  ;;  %544 = vmatpush3.bf16.msra.mxu1 %v596_v17 }
  0x69   :  { %549 = vmatprep.subr.bf16.mxu0 %v729_v0 }
  0x6b   :  { %526 = vmatmul.mubr.bf16.vlgmr.msra.gmra.mrb[0].mxu0 %v588_v15 }
  0x6c   :  { %565 = vmatprep.mubr.msk.bf16.mxu0 %vm730_vm0, %v729_v0  ;;  %550 = vmatpush3.bf16.msra.mxu0 %v597_v18 }
  0x6d   :  { %551 = vmatprep.subr.bf16.mxu0 %v729_v0 }
  0x70   :  { %552 = vmatpush3.bf16.msra.mxu0 %v598_v19 }
  0x71   :  { %553 = vmatprep.subr.bf16.mxu0 %v729_v0 }
  0x74   :  { %554 = vmatpush3.bf16.msra.mxu0 %v599_v20 }
  0x75   :  { %555 = vmatprep.subr.bf16.mxu0 %v729_v0 }
  0x78   :  { %556 = vmatpush3.bf16.msra.mxu0 %v600_v21 }
  0x79   :  { %557 = vmatprep.subr.bf16.mxu0 %v729_v0 }
  0x7c   :  { %558 = vmatpush3.bf16.msra.mxu0 %v601_v22 }
  0x7d   :  { %559 = vmatprep.subr.bf16.mxu0 %v729_v0 }
  0x80   :  { %560 = vmatpush3.bf16.msra.mxu0 %v602_v23 }
  0x81   :  { %561 = vmatprep.subr.bf16.mxu0 %v729_v0 }
  0x84   :  { %562 = vmatpush3.bf16.msra.mxu0 %v603_v34 }
  0x85   :  { %563 = vmatprep.subr.bf16.mxu0 %v729_v0 }
  0x88   :  { %564 = vmatpush3.bf16.msra.mxu0 %v604_v35 }
 0x13e   :  { %v196_v25 = vpop.f32.mrb[0].mxu0 }
 0x13f   :  { %v197_v26 = vadd.f32 %v454_v24, %v196_v25  ;;  %v527_v27 = vpop.f32.mrb[1].mxu0 }
 0x140   :  { %v199_v28 = vpop.f32.mrb[2].mxu0 }
 0x141   :  { %v200_v29 = vadd.f32 %v454_v24, %v199_v28  ;;  %v528_v30 = vpop.f32.mrb[3].mxu0  ;;  %v203_v31 = vmax.f32 %v197_v26, 0.0 }
 0x143   :  { %v204_v32 = vmax.f32 %v200_v29, 0.0 }
 0x145   :  { %v205_v33 = vpack.c.bf16 %v204_v32, %v203_v31 }
 0x147   :  { %546 = vmatmul.mubr.bf16.vlgmr.msra.gmra.mrb[0].mxu1 %v205_v33 }
 0x21a   :  { %v311_v37 = vpop.f32.mrb[0].mxu1 }
 0x21b   :  { %v312_v38 = vadd.f32 %v464_v36, %v311_v37  ;;  %v547_v39 = vpop.f32.mrb[1].mxu1 }
 0x21c   :  { %v314_v40 = vpop.f32.mrb[2].mxu1 }
 0x21d   :  { %v315_v41 = vadd.f32 %v464_v36, %v314_v40  ;;  %v548_v42 = vpop.f32.mrb[3].mxu1  ;;  %v318_v43 = vmax.f32 %v312_v38, 0.0 }
 0x21f   :  { %v319_v44 = vmax.f32 %v315_v41, 0.0 }
 0x221   :  { %v320_v45 = vpack.c.bf16 %v319_v44, %v318_v43 }
 0x223   :  { %566 = vmatmul.mubr.bf16.vlgmr.msra.gmra.mrb[4].mxu0 %v320_v45 }
 0x2f6   :  { %v426_v47 = vpop.f32.mrb[4].mxu0 }
 0x2f7   :  { %v427_v48 = vadd.f32 %v473_v46, %v426_v47  ;;  %v567_v49 = vpop.f32.mrb[5].mxu0 }
 0x2f8   :  { %v429_v50 = vpop.f32.mrb[6].mxu0 }
 0x2f9   :  { %433 = vst [vmem:[#allocation10] sm:$0xff] %v427_v48  ;;  %v430_v51 = vadd.f32 %v473_v46, %v429_v50  ;;  %v568_v52 = vpop.f32.mrb[7].mxu0 }
 0x2fb   :  { %434 = vst [vmem:[#allocation10 + $0x8] sm:$0xff] %v430_v51 }
 0x2fc   :  { %704 = shalt.err (!%p701_p8)
}
 0x2fd   :  { %s705_s9 = scalar_lea.hbm %s906_s7, 256 }
 0x2fe   :  { %p706_p9 = scmp.ne.s32.totalorder %s906_s7, %s705_s9  ;;  %p709_p10 = scmp.lt.u32.totalorder %s705_s9, %s906_s7 }
 0x300   :  { %p711_p11 = pnand %p709_p10, %p706_p9 }
 0x302   :  { %714 = shalt.err (!%p711_p11)
}
 0x303   :  { %s732_s16 = smov 128   ;;  %s733_s0 = smov 8  }
 0x304   :  { %446 = dma.vmem_to_hbm [thread:$0]  %s441_s30, 256, %s906_s7, [#allocation4], %s732_s16, %s732_s16, %s733_s0  }
 0x305   :  { %721 = dma.done.wait [#allocation4], 256  }
 0x306   :  { %722 = vsyncadd [#allocation4], 4294967040 }
 0x307   :  { %450 = vsyncpa [#allocation3], 1 }
 0x308   :  { %451 = vsyncpa [#allocation6], 1 }
 0x309   :  { %452 = vsyncpa [#allocation9], 1 }
 0x30a   :  { %453 = vsyncpa [#allocation4], 1 }

// kernel: tpu_custom_call.1
= control target key start
LH: loop header
LB: loop body
LE: loop exit
PB: predicated region body
PF: predicated region fallthrough
CT: control target
= control target key end

     0   :  { %12 = vsyncpa [#allocation3], 0  ;;  %s899_s0 = inlined_call_operand.hbm [shape: bf16[16,128], index: 0, kind: input, shape index: {}]   ;;  %s900_s1 = inlined_call_operand.hbm [shape: bf16[128,128], index: 1, kind: input, shape index: {}]   ;;  %s901_s2 = inlined_call_operand.vmem [shape: f32[1,128], index: 2, kind: input, shape index: {}]   ;;  %s902_s3 = inlined_call_operand.hbm [shape: bf16[128,128], index: 3, kind: input, shape index: {}]   ;;  %s903_s4 = inlined_call_operand.vmem [shape: f32[1,128], index: 4, kind: input, shape index: {}]   ;;  %s904_s5 = inlined_call_operand.hbm [shape: bf16[128,128], index: 5, kind: input, shape index: {}]   ;;  %s905_s6 = inlined_call_operand.vmem [shape: f32[1,128], index: 6, kind: input, shape index: {}]   ;;  %s906_s7 = inlined_call_operand.hbm [shape: f32[16,128], index: 7, kind: output, shape index: {}]  }
   0x1   :  { %13 = vsyncpa [#allocation6], 0 }
   0x2   :  { %14 = vsyncpa [#allocation9], 0 }
   0x3   :  { %15 = vsyncpa [#allocation4], 0  ;;  %s723_s24 = smov [#allocation5]   ;;  %s724_s26 = smov [#allocation2]  }
   0x4   :  { %s33_s25 = sshll.u32 %s723_s24, 4  ;;  %s21_s27 = sshll.u32 %s724_s26, 4  ;;  %s34_s25 = int_to_ptr.vmem [resolvable:$true] %s33_s25  ;;  %s774_s27 = int_to_ptr.vmem [resolvable:$true] %s21_s27 }
   0x5   :  { %s605_s30 = scalar_lea.hbm %s900_s1, 1024 }
   0x6   :  { %p606_p0 = scmp.ne.s32.totalorder %s900_s1, %s605_s30  ;;  %p609_p1 = scmp.lt.u32.totalorder %s605_s30, %s900_s1 }
   0x8   :  { %p611_p2 = pnand %p609_p1, %p606_p0 }
   0xa   :  { %614 = shalt.err (!%p611_p2)
}
   0xb   :  { %s615_s12 = scalar_lea.vmem %s34_s25, 1024  ;;  %p620_p4 = scmp.lt.s32.totalorder %s34_s25, %s34_s25 }
   0xc   :  { %p616_p3 = scmp.ne.s32.totalorder %s34_s25, %s615_s12  ;;  %p621_p5 = scmp.lt.s32.totalorder %s615_s12, %s615_s12 }
   0xe   :  { %p622_p6 = por %p621_p5, %p620_p4 }
  0x10   :  { %p623_p7 = pnand %p622_p6, %p616_p3 }
  0x12   :  { %626 = shalt.err (!%p623_p7)
}
  0x13   :  { %s725_s13 = smov 64   ;;  %s726_s14 = smov 4  }
  0x14   :  { %39 = dma.hbm_to_vmem [thread:$0]  %s900_s1, 1024, %s34_s25, [#allocation6], %s725_s13, %s725_s13, %s726_s14  }
  0x15   :  { %s627_s19 = scalar_lea.hbm %s899_s0, 128 }
  0x16   :  { %p628_p8 = scmp.ne.s32.totalorder %s899_s0, %s627_s19  ;;  %p631_p9 = scmp.lt.u32.totalorder %s627_s19, %s899_s0 }
  0x18   :  { %p633_p10 = pnand %p631_p9, %p628_p8 }
  0x1a   :  { %636 = shalt.err (!%p633_p10)
}
  0x1b   :  { %s637_s24 = scalar_lea.vmem %s774_s27, 128  ;;  %p642_p12 = scmp.lt.s32.totalorder %s774_s27, %s774_s27 }
  0x1c   :  { %p638_p11 = scmp.ne.s32.totalorder %s774_s27, %s637_s24  ;;  %p643_p13 = scmp.lt.s32.totalorder %s637_s24, %s637_s24 }
  0x1e   :  { %p644_p0 = por %p643_p13, %p642_p12 }
  0x20   :  { %p645_p1 = pnand %p644_p0, %p638_p11 }
  0x22   :  { %648 = shalt.err (!%p645_p1)
}
  0x23   :  { %27 = dma.hbm_to_vmem [thread:$0]  %s899_s0, 128, %s774_s27, [#allocation3], %s725_s13, %s725_s13, %s726_s14  }
  0x24   :  { %s727_s26 = smov [#allocation7]   ;;  %s728_s29 = smov [#allocation8]  }
  0x25   :  { %s47_s28 = sshll.u32 %s727_s26, 4  ;;  %s61_s30 = sshll.u32 %s728_s29, 4  ;;  %s48_s28 = int_to_ptr.vmem [resolvable:$true] %s47_s28  ;;  %s811_s30 = int_to_ptr.vmem [resolvable:$true] %s61_s30 }
  0x26   :  { %s649_s10 = scalar_lea.hbm %s902_s3, 1024 }
  0x27   :  { %p650_p2 = scmp.ne.s32.totalorder %s902_s3, %s649_s10  ;;  %p653_p3 = scmp.lt.u32.totalorder %s649_s10, %s902_s3 }
  0x29   :  { %p655_p4 = pnand %p653_p3, %p650_p2 }
  0x2b   :  { %658 = shalt.err (!%p655_p4)
}
  0x2c   :  { %s659_s0 = scalar_lea.vmem %s48_s28, 1024  ;;  %p664_p6 = scmp.lt.s32.totalorder %s48_s28, %s48_s28 }
  0x2d   :  { %p660_p5 = scmp.ne.s32.totalorder %s48_s28, %s659_s0  ;;  %p665_p7 = scmp.lt.s32.totalorder %s659_s0, %s659_s0 }
  0x2f   :  { %p666_p8 = por %p665_p7, %p664_p6 }
  0x31   :  { %p667_p9 = pnand %p666_p8, %p660_p5 }
  0x33   :  { %670 = shalt.err (!%p667_p9)
}
  0x34   :  { %53 = dma.hbm_to_vmem [thread:$0]  %s902_s3, 1024, %s48_s28, [#allocation6], %s725_s13, %s725_s13, %s726_s14  }
  0x35   :  { %s671_s20 = scalar_lea.hbm %s904_s5, 1024 }
  0x36   :  { %p672_p10 = scmp.ne.s32.totalorder %s904_s5, %s671_s20  ;;  %p675_p11 = scmp.lt.u32.totalorder %s671_s20, %s904_s5 }
  0x38   :  { %p677_p12 = pnand %p675_p11, %p672_p10 }
  0x3a   :  { %680 = shalt.err (!%p677_p12)
}
  0x3b   :  { %s681_s1 = scalar_lea.vmem %s811_s30, 1024  ;;  %p686_p0 = scmp.lt.s32.totalorder %s811_s30, %s811_s30 }
  0x3c   :  { %p682_p13 = scmp.ne.s32.totalorder %s811_s30, %s681_s1  ;;  %p687_p1 = scmp.lt.s32.totalorder %s681_s1, %s681_s1 }
  0x3e   :  { %p688_p2 = por %p687_p1, %p686_p0 }
  0x40   :  { %p689_p3 = pnand %p688_p2, %p682_p13 }
  0x42   :  { %692 = shalt.err (!%p689_p3)
}
  0x43   :  { %67 = dma.hbm_to_vmem [thread:$0]  %s904_s5, 1024, %s811_s30, [#allocation9], %s725_s13, %s725_s13, %s726_s14  }
  0x44   :  { %715 = dma.done.wait [#allocation3], 128  }
  0x45   :  { %716 = vsyncadd [#allocation3], 4294967168 }
  0x46   :  { %717 = dma.done.wait [#allocation6], 2048  }
  0x47   :  { %718 = vsyncadd [#allocation6], 4294965248 }
  0x48   :  { %719 = dma.done.wait [#allocation9], 1024  }
  0x49   :  { %720 = vsyncadd [#allocation9], 4294966272  ;;  %v729_v0 = vmov 0.0   ;;  %vm730_vm0 = vmmov 0   ;;  %v580_v1 = vld [vmem:[#allocation5] sm:$0xff]   ;;  %v581_v2 = vld [vmem:[#allocation5 + $0x8] sm:$0xff]  }
  0x4a   :  { %509 = vmatprep.subr.bf16.mxu0 %v729_v0  ;;  %525 = vmatprep.mubr.msk.bf16.mxu0 %vm730_vm0, %v729_v0  ;;  %v582_v3 = vld [vmem:[#allocation5 + $0x10] sm:$0xff]   ;;  %v589_v4 = vld [vmem:[#allocation7] sm:$0xff]   ;;  %v583_v5 = vld [vmem:[#allocation5 + $0x18] sm:$0xff]   ;;  %s731_s29 = smov [#allocation10]  }
  0x4b   :  { %529 = vmatprep.subr.bf16.mxu1 %v729_v0  ;;  %545 = vmatprep.mubr.msk.bf16.mxu1 %vm730_vm0, %v729_v0  ;;  %v590_v6 = vld [vmem:[#allocation7 + $0x8] sm:$0xff]   ;;  %v584_v7 = vld [vmem:[#allocation5 + $0x20] sm:$0xff]   ;;  %v591_v8 = vld [vmem:[#allocation7 + $0x10] sm:$0xff]   ;;  %s440_s30 = sshll.u32 %s731_s29, 4  ;;  %s441_s30 = int_to_ptr.vmem [resolvable:$true] %s440_s30 }
  0x4c   :  { %510 = vmatpush3.bf16.msra.mxu0 %v580_v1  ;;  %530 = vmatpush3.bf16.msra.mxu1 %v589_v4  ;;  %v585_v9 = vld [vmem:[#allocation5 + $0x28] sm:$0xff]   ;;  %v592_v10 = vld [vmem:[#allocation7 + $0x18] sm:$0xff]   ;;  %v586_v11 = vld [vmem:[#allocation5 + $0x30] sm:$0xff]   ;;  %p698_p5 = scmp.lt.s32.totalorder %s441_s30, %s441_s30 }
  0x4d   :  { %511 = vmatprep.subr.bf16.mxu0 %v729_v0  ;;  %531 = vmatprep.subr.bf16.mxu1 %v729_v0  ;;  %v593_v12 = vld [vmem:[#allocation7 + $0x20] sm:$0xff]   ;;  %v587_v13 = vld [vmem:[#allocation5 + $0x38] sm:$0xff]   ;;  %v594_v14 = vld [vmem:[#allocation7 + $0x28] sm:$0xff]  }
  0x4e   :  { %v588_v15 = vld [vmem:[#allocation2] sm:$0xff]   ;;  %v595_v16 = vld [vmem:[#allocation7 + $0x30] sm:$0xff]   ;;  %v597_v18 = vld [vmem:[#allocation8] sm:$0xff]  }
  0x4f   :  { %v596_v17 = vld [vmem:[#allocation7 + $0x38] sm:$0xff]   ;;  %v598_v19 = vld [vmem:[#allocation8 + $0x8] sm:$0xff]   ;;  %v599_v20 = vld [vmem:[#allocation8 + $0x10] sm:$0xff]  }
  0x50   :  { %512 = vmatpush3.bf16.msra.mxu0 %v581_v2  ;;  %532 = vmatpush3.bf16.msra.mxu1 %v590_v6  ;;  %v600_v21 = vld [vmem:[#allocation8 + $0x18] sm:$0xff]   ;;  %v601_v22 = vld [vmem:[#allocation8 + $0x20] sm:$0xff]   ;;  %v602_v23 = vld [vmem:[#allocation8 + $0x28] sm:$0xff]  }
  0x51   :  { %513 = vmatprep.subr.bf16.mxu0 %v729_v0  ;;  %533 = vmatprep.subr.bf16.mxu1 %v729_v0  ;;  %v454_v24 = vld [vmem:[%s901_s2] ss:$0 sm:$0xff]  ;;  %v603_v34 = vld [vmem:[#allocation8 + $0x30] sm:$0xff]  }
  0x52   :  { %v604_v35 = vld [vmem:[#allocation8 + $0x38] sm:$0xff]  }
  0x53   :  { %v464_v36 = vld [vmem:[%s903_s4] ss:$0 sm:$0xff]  ;;  %s693_s4 = scalar_lea.vmem %s441_s30, 256 }
  0x54   :  { %514 = vmatpush3.bf16.msra.mxu0 %v582_v3  ;;  %534 = vmatpush3.bf16.msra.mxu1 %v591_v8  ;;  %v473_v46 = vld [vmem:[%s905_s6] ss:$0 sm:$0xff]  ;;  %p694_p4 = scmp.ne.s32.totalorder %s441_s30, %s693_s4  ;;  %p699_p6 = scmp.lt.s32.totalorder %s693_s4, %s693_s4 }
  0x55   :  { %515 = vmatprep.subr.bf16.mxu0 %v729_v0  ;;  %535 = vmatprep.subr.bf16.mxu1 %v729_v0 }
  0x56   :  { %p700_p7 = por %p699_p6, %p698_p5 }
  0x58   :  { %516 = vmatpush3.bf16.msra.mxu0 %v583_v5  ;;  %536 = vmatpush3.bf16.msra.mxu1 %v592_v10  ;;  %p701_p8 = pnand %p700_p7, %p694_p4 }
  0x59   :  { %517 = vmatprep.subr.bf16.mxu0 %v729_v0  ;;  %537 = vmatprep.subr.bf16.mxu1 %v729_v0 }
  0x5c   :  { %518 = vmatpush3.bf16.msra.mxu0 %v584_v7  ;;  %538 = vmatpush3.bf16.msra.mxu1 %v593_v12 }
  0x5d   :  { %519 = vmatprep.subr.bf16.mxu0 %v729_v0  ;;  %539 = vmatprep.subr.bf16.mxu1 %v729_v0 }
  0x60   :  { %520 = vmatpush3.bf16.msra.mxu0 %v585_v9  ;;  %540 = vmatpush3.bf16.msra.mxu1 %v594_v14 }
  0x61   :  { %521 = vmatprep.subr.bf16.mxu0 %v729_v0  ;;  %541 = vmatprep.subr.bf16.mxu1 %v729_v0 }
  0x64   :  { %522 = vmatpush3.bf16.msra.mxu0 %v586_v11  ;;  %542 = vmatpush3.bf16.msra.mxu1 %v595_v16 }
  0x65   :  { %523 = vmatprep.subr.bf16.mxu0 %v729_v0  ;;  %543 = vmatprep.subr.bf16.mxu1 %v729_v0 }
  0x68   :  { %524 = vmatpush3.bf16.msra.mxu0 %v587_v13  ;;  %544 = vmatpush3.bf16.msra.mxu1 %v596_v17 }
  0x69   :  { %549 = vmatprep.subr.bf16.mxu0 %v729_v0 }
  0x6b   :  { %526 = vmatmul.mubr.bf16.vlgmr.msra.gmra.mrb[0].mxu0 %v588_v15 }
  0x6c   :  { %565 = vmatprep.mubr.msk.bf16.mxu0 %vm730_vm0, %v729_v0  ;;  %550 = vmatpush3.bf16.msra.mxu0 %v597_v18 }
  0x6d   :  { %551 = vmatprep.subr.bf16.mxu0 %v729_v0 }
  0x70   :  { %552 = vmatpush3.bf16.msra.mxu0 %v598_v19 }
  0x71   :  { %553 = vmatprep.subr.bf16.mxu0 %v729_v0 }
  0x74   :  { %554 = vmatpush3.bf16.msra.mxu0 %v599_v20 }
  0x75   :  { %555 = vmatprep.subr.bf16.mxu0 %v729_v0 }
  0x78   :  { %556 = vmatpush3.bf16.msra.mxu0 %v600_v21 }
  0x79   :  { %557 = vmatprep.subr.bf16.mxu0 %v729_v0 }
  0x7c   :  { %558 = vmatpush3.bf16.msra.mxu0 %v601_v22 }
  0x7d   :  { %559 = vmatprep.subr.bf16.mxu0 %v729_v0 }
  0x80   :  { %560 = vmatpush3.bf16.msra.mxu0 %v602_v23 }
  0x81   :  { %561 = vmatprep.subr.bf16.mxu0 %v729_v0 }
  0x84   :  { %562 = vmatpush3.bf16.msra.mxu0 %v603_v34 }
  0x85   :  { %563 = vmatprep.subr.bf16.mxu0 %v729_v0 }
  0x88   :  { %564 = vmatpush3.bf16.msra.mxu0 %v604_v35 }
 0x13e   :  { %v196_v25 = vpop.f32.mrb[0].mxu0 }
 0x13f   :  { %v197_v26 = vadd.f32 %v454_v24, %v196_v25  ;;  %v527_v27 = vpop.f32.mrb[1].mxu0 }
 0x140   :  { %v199_v28 = vpop.f32.mrb[2].mxu0 }
 0x141   :  { %v200_v29 = vadd.f32 %v454_v24, %v199_v28  ;;  %v528_v30 = vpop.f32.mrb[3].mxu0  ;;  %v203_v31 = vmax.f32 %v197_v26, 0.0 }
 0x143   :  { %v204_v32 = vmax.f32 %v200_v29, 0.0 }
 0x145   :  { %v205_v33 = vpack.c.bf16 %v204_v32, %v203_v31 }
 0x147   :  { %546 = vmatmul.mubr.bf16.vlgmr.msra.gmra.mrb[0].mxu1 %v205_v33 }
 0x21a   :  { %v311_v37 = vpop.f32.mrb[0].mxu1 }
 0x21b   :  { %v312_v38 = vadd.f32 %v464_v36, %v311_v37  ;;  %v547_v39 = vpop.f32.mrb[1].mxu1 }
 0x21c   :  { %v314_v40 = vpop.f32.mrb[2].mxu1 }
 0x21d   :  { %v315_v41 = vadd.f32 %v464_v36, %v314_v40  ;;  %v548_v42 = vpop.f32.mrb[3].mxu1  ;;  %v318_v43 = vmax.f32 %v312_v38, 0.0 }
 0x21f   :  { %v319_v44 = vmax.f32 %v315_v41, 0.0 }
 0x221   :  { %v320_v45 = vpack.c.bf16 %v319_v44, %v318_v43 }
 0x223   :  { %566 = vmatmul.mubr.bf16.vlgmr.msra.gmra.mrb[4].mxu0 %v320_v45 }
 0x2f6   :  { %v426_v47 = vpop.f32.mrb[4].mxu0 }
 0x2f7   :  { %v427_v48 = vadd.f32 %v473_v46, %v426_v47  ;;  %v567_v49 = vpop.f32.mrb[5].mxu0 }
 0x2f8   :  { %v429_v50 = vpop.f32.mrb[6].mxu0 }
 0x2f9   :  { %433 = vst [vmem:[#allocation10] sm:$0xff] %v427_v48  ;;  %v430_v51 = vadd.f32 %v473_v46, %v429_v50  ;;  %v568_v52 = vpop.f32.mrb[7].mxu0 }
 0x2fb   :  { %434 = vst [vmem:[#allocation10 + $0x8] sm:$0xff] %v430_v51 }
 0x2fc   :  { %704 = shalt.err (!%p701_p8)
}
 0x2fd   :  { %s705_s9 = scalar_lea.hbm %s906_s7, 256 }
 0x2fe   :  { %p706_p9 = scmp.ne.s32.totalorder %s906_s7, %s705_s9  ;;  %p709_p10 = scmp.lt.u32.totalorder %s705_s9, %s906_s7 }
 0x300   :  { %p711_p11 = pnand %p709_p10, %p706_p9 }
 0x302   :  { %714 = shalt.err (!%p711_p11)
}
 0x303   :  { %s732_s16 = smov 128   ;;  %s733_s0 = smov 8  }
 0x304   :  { %446 = dma.vmem_to_hbm [thread:$0]  %s441_s30, 256, %s906_s7, [#allocation4], %s732_s16, %s732_s16, %s733_s0  }
 0x305   :  { %721 = dma.done.wait [#allocation4], 256  }
 0x306   :  { %722 = vsyncadd [#allocation4], 4294967040 }
 0x307   :  { %450 = vsyncpa [#allocation3], 1 }
 0x308   :  { %451 = vsyncpa [#allocation6], 1 }
 0x309   :  { %452 = vsyncpa [#allocation9], 1 }
 0x30a   :  { %453 = vsyncpa [#allocation4], 1 }

</bundles_post_ra>
